<compile_context>
chip_gen: v6e
topology: v6e:2x2x1
jax: 0.10.0
libtpu: 0.0.40
codegen_flags: <defaults>
</compile_context>

<pallas_src>
import jax
import jax.numpy as jnp
from jax import lax
from jax.experimental import pallas as pl
from jax.experimental.pallas import tpu as pltpu

_LANES = 128
_SUBLANES = 8
_MAX_BLOCK_ROWS = 8192   # 8192 x 128 x 4B = 4 MiB/block; portable v5e/v6e/v7x.
                         # (v7x tolerates 16384 rows; 8192 keeps v5e's 16 MiB
                         #  scoped-VMEM default comfortable with 2 buffers.)
_NUM_CORE_SPLITS = 2     # v7x has 2 TensorCores; extra accumulator row is
                         # harmless on single-core v5e/v6e.


# ---------------------------------------------------------------------------
# Kernel: streaming partial sums of (1 - |label|)
# ---------------------------------------------------------------------------
def _make_count_kernel(block_rows, blocks_per_core, valid_rows):
    groups = block_rows // _SUBLANES
    # Mask only needed when the (cores x blocks x block_rows) cover exceeds the
    # real row count (ragged trailing block / odd block count / core overshoot).
    need_mask = (_NUM_CORE_SPLITS * blocks_per_core * block_rows) != valid_rows

    def kernel(label_ref, acc_ref):
        p = pl.program_id(0)   # core split (parallel)
        j = pl.program_id(1)   # block loop (arbitrary / reduction)

        @pl.when(j == 0)
        def _init():
            acc_ref[...] = jnp.zeros_like(acc_ref)

        lab = label_ref[...].astype(jnp.float32)   # in-vreg upcast; HBM stays narrow
        contrib = 1.0 - jnp.abs(lab)

        if need_mask:
            g = p * blocks_per_core + j
            row0 = g * block_rows
            row_idx = lax.broadcasted_iota(jnp.int32, (block_rows, _LANES), 0) + row0
            contrib = jnp.where(row_idx < valid_rows, contrib, 0.0)

        # VALU-only partial reduce into the resident (8,128) accumulator; the
        # cross-sublane/lane (XLU) reduce is deferred to the XLA epilogue.
        acc_ref[...] += contrib.reshape(groups, _SUBLANES, _LANES).sum(axis=0)

    return kernel


def count_batch_size(label, *, max_block_rows=_MAX_BLOCK_ROWS):
    """On-device (1 - |label|).sum() truncated to int32 (torch `.long()` semantics;
    int32 because TPU x64 is disabled)."""
    flat = jnp.ravel(label)                 # free for contiguous inputs
    n = flat.shape[0]

    rows = n // _LANES
    rem = n - rows * _LANES

    total = jnp.float32(0.0)
    if rem:
        # <128-element remainder summed in XLA (tiny).
        tail = flat[rows * _LANES:]
        total = total + jnp.sum(1.0 - jnp.abs(tail.astype(jnp.float32)))

    if rows >= _SUBLANES:
        # Bitcast-reshape when n % 128 == 0; otherwise a prefix slice (the only
        # remaining copy, and only for lane-ragged inputs).
        main = flat[: rows * _LANES].reshape(rows, _LANES)

        block_rows = min(max_block_rows, (rows // _SUBLANES) * _SUBLANES)
        blocks_total = pl.cdiv(rows, block_rows)
        blocks_per_core = pl.cdiv(blocks_total, _NUM_CORE_SPLITS)

        kernel = _make_count_kernel(block_rows, blocks_per_core, rows)

        def in_map(p, j):
            g = p * blocks_per_core + j
            # Clamp out-of-range block indices; their contribution is zeroed by
            # the in-kernel row mask (never relies on unspecified padding).
            return (jnp.minimum(g, blocks_total - 1), 0)

        block_bytes = block_rows * _LANES * flat.dtype.itemsize
        vmem_limit = 2 * block_bytes + (2 << 20)   # double-buffered input + slack

        partials = pl.pallas_call(
            kernel,
            out_shape=jax.ShapeDtypeStruct(
                (_NUM_CORE_SPLITS * _SUBLANES, _LANES), jnp.float32),
            grid=(_NUM_CORE_SPLITS, blocks_per_core),
            in_specs=[pl.BlockSpec((block_rows, _LANES), in_map)],
            out_specs=pl.BlockSpec((_SUBLANES, _LANES), lambda p, j: (p, 0)),
            compiler_params=pltpu.CompilerParams(
                dimension_semantics=("parallel", "arbitrary"),
                vmem_limit_bytes=vmem_limit,
            ),
        )(main)
        total = total + jnp.sum(partials)
    elif rows > 0:
        # < 1024 elements: not worth a kernel launch; XLA sum.
        head = flat[: rows * _LANES]
        total = total + jnp.sum(1.0 - jnp.abs(head.astype(jnp.float32)))

    return total.astype(jnp.int32)


# ---------------------------------------------------------------------------
# Loss.forward
# ---------------------------------------------------------------------------
def loss_forward(score, label, element_type="triple", batch_size=None):
    assert element_type in ("triple", "pair"), "element_type must be triple or pair"

    if element_type == "pair":
        # TODO(synk): forward_pair is abstract in the base class; nothing to lower.
        return score, label

    # torch: batch_size = (1 - |label|).sum().long() -- computed fully on-device
    # by the Pallas reduction and returned so callers can verify it against the
    # structural batch size without a host round trip.
    batch_size_dev = count_batch_size(label)

    if batch_size is None:
        if score.ndim < 2:
            raise ValueError("pass batch_size explicitly for pre-flattened 1-D score")
        # Structural batch_size: the (num_samples, batch) row-major layout puts
        # the positives (label == 0) in the first row, so the data-dependent
        # count equals the trailing dim; using the static shape keeps shapes
        # jit-able (no data-dependent reshape).
        batch_size = score.shape[-1]

    if score.ndim >= 2 and score.shape[-1] == batch_size:
        # Row-slice the 2-D layout directly: avoids the unaligned flat slice at
        # offset batch_size and the extra ravel copy.
        score2d = score.reshape(-1, batch_size)     # free for contiguous inputs
        pos_score = score2d[:1].T                   # (batch, 1)
        neg_score = score2d[1:].T                   # (batch, n_neg)
    else:
        score_flat = jnp.ravel(score)
        pos_score = score_flat[:batch_size].reshape(-1, batch_size).T
        neg_score = score_flat[batch_size:].reshape(-1, batch_size).T

    # TODO(synk): forward_triple is abstract in the base class; a concrete loss
    # kernel should keep the lane-dense (k, batch) layout (fold the transpose
    # into its BlockSpec/contraction dims) and fuse the label pass so the
    # batch_size count costs no extra HBM read.
    return pos_score, neg_score, batch_size_dev


if __name__ == "__main__":
    key = jax.random.PRNGKey(0)

    batch = 128       # number of positive triples
    neg_ratio = 15    # negatives per positive

    # score: first row = positive scores, remaining rows = negative scores
    score = jax.random.normal(key, (1 + neg_ratio, batch), dtype=jnp.float32)

    # label: 0 for positives (1 - |label| = 1), -1 for negatives
    label = jnp.concatenate(
        [
            jnp.zeros((1, batch), dtype=jnp.float32),
            -jnp.ones((neg_ratio, batch), dtype=jnp.float32),
        ],
        axis=0,
    )

    fwd = jax.jit(loss_forward, static_argnames=("element_type", "batch_size"))
    pos_score, neg_score, bs_dev = fwd(score, label, element_type="triple")
    jax.block_until_ready((pos_score, neg_score, bs_dev))

    assert pos_score.shape == (batch, 1)
    assert neg_score.shape == (batch, neg_ratio)

    # reference check against plain-JAX semantics of the torch code
    ref_bs = int(jnp.sum(1.0 - jnp.abs(label)))
    assert int(bs_dev) == ref_bs == batch
    sf = jnp.ravel(score)
    ref_pos = sf[:ref_bs].reshape(-1, ref_bs).T
    ref_neg = sf[ref_bs:].reshape(-1, ref_bs).T
    assert jnp.allclose(pos_score, ref_pos)
    assert jnp.allclose(neg_score, ref_neg)

    # larger sizes: lane-aligned ragged blocks, fully ragged tail, tiny fallback
    count_jit = jax.jit(count_batch_size)
    for n_big in (300_032, 300_000, 777):
        lab_big = jnp.where(
            jax.random.uniform(jax.random.PRNGKey(1), (n_big,)) < 0.25, 0.0, -1.0
        )
        ref_cnt = int(jnp.sum(1.0 - jnp.abs(lab_big)))
        assert int(count_jit(lab_big)) == ref_cnt
        # narrow-dtype streaming path (labels are exactly representable in bf16)
        assert int(count_jit(lab_big.astype(jnp.bfloat16))) == ref_cnt

    print("KERNEL_OK")
</pallas_src>

<mosaic_0001>
module attributes {stable_mosaic.version = 11 : i64} {
  func.func @kernel(%arg0: i32, %arg1: i32, %arg2: memref<16x128xf32, #tpu.memory_space<vmem>>, %arg3: memref<8x128xf32, #tpu.memory_space<vmem>>) attributes {dimension_semantics = [#tpu.dimension_semantics<parallel>, #tpu.dimension_semantics<arbitrary>], iteration_bounds = array<i64: 2, 1>, scalar_prefetch = 0 : i64, scratch_operands = 0 : i64, tpu.core_type = #tpu.core_type<tc>, window_params = [{transform_indices = @transform_0, window_bounds = array<i64: 16, 128>}, {transform_indices = @transform_1, window_bounds = array<i64: 8, 128>}]} {
    %c0_i32 = arith.constant 0 : i32
    %0 = arith.cmpi eq, %arg1, %c0_i32 : i32
    %1 = arith.extui %0 : i1 to i32
    %c0_i32_0 = arith.constant 0 : i32
    %2 = arith.cmpi ne, %1, %c0_i32_0 : i32
    scf.if %2 {
      %cst_9 = arith.constant 0.000000e+00 : f32
      %22 = vector.broadcast %cst_9 : f32 to vector<8x128xf32>
      %c0_10 = arith.constant 0 : index
      %c0_11 = arith.constant 0 : index
      %23 = vector.load %arg3[%c0_10, %c0_11] : memref<8x128xf32, #tpu.memory_space<vmem>>, vector<8x128xf32>
      tpu.vector_store %arg3[%c0_10, %c0_11], %22 {strides = array<i32>} : memref<8x128xf32, #tpu.memory_space<vmem>>, vector<8x128xf32>,
    } else {
    }
    %c0 = arith.constant 0 : index
    %c0_1 = arith.constant 0 : index
    %3 = vector.load %arg2[%c0, %c0_1] : memref<16x128xf32, #tpu.memory_space<vmem>>, vector<16x128xf32>
    %4 = math.absf %3 : vector<16x128xf32>
    %cst = arith.constant 1.000000e+00 : f32
    %5 = vector.broadcast %cst : f32 to vector<16x128xf32>
    %6 = arith.subf %5, %4 : vector<16x128xf32>
    %c1_i32 = arith.constant 1 : i32
    %7 = arith.muli %arg0, %c1_i32 : i32
    %8 = arith.addi %7, %arg1 : i32
    %c16_i32 = arith.constant 16 : i32
    %9 = arith.muli %8, %c16_i32 : i32
    %10 = tpu.iota {dimensions = array<i32: 0>} : vector<16x128xi32>
    %11 = vector.broadcast %9 : i32 to vector<16x128xi32>
    %12 = arith.addi %10, %11 : vector<16x128xi32>
    %c16_i32_2 = arith.constant 16 : i32
    %13 = vector.broadcast %c16_i32_2 : i32 to vector<16x128xi32>
    %14 = arith.cmpi slt, %12, %13 : vector<16x128xi32>
    %cst_3 = arith.constant 0.000000e+00 : f32
    %15 = vector.broadcast %cst_3 : f32 to vector<16x128xf32>
    %16 = arith.select %14, %6, %15 : vector<16x128xi1>, vector<16x128xf32>
    %c0_4 = arith.constant 0 : index
    %c0_5 = arith.constant 0 : index
    %17 = vector.load %arg3[%c0_4, %c0_5] : memref<8x128xf32, #tpu.memory_space<vmem>>, vector<8x128xf32>
    %18 = vector.shape_cast %16 : vector<16x128xf32> to vector<2x8x128xf32>
    %cst_6 = arith.constant dense<0.000000e+00> : vector<8x128xf32>
    %19 = vector.multi_reduction <add>, %18, %cst_6 [0] : vector<2x8x128xf32> to vector<8x128xf32>
    %20 = arith.addf %17, %19 : vector<8x128xf32>
    %c0_7 = arith.constant 0 : index
    %c0_8 = arith.constant 0 : index
    %21 = vector.load %arg3[%c0_7, %c0_8] : memref<8x128xf32, #tpu.memory_space<vmem>>, vector<8x128xf32>
    tpu.vector_store %arg3[%c0_7, %c0_8], %20 {strides = array<i32>} : memref<8x128xf32, #tpu.memory_space<vmem>>, vector<8x128xf32>,
    return
  }
  func.func @transform_0(%arg0: i32, %arg1: i32) -> (i32, i32) {
    %c1_i32 = arith.constant 1 : i32
    %0 = arith.muli %arg0, %c1_i32 : i32
    %1 = arith.addi %0, %arg1 : i32
    %c0_i32 = arith.constant 0 : i32
    %2 = arith.minsi %1, %c0_i32 : i32
    %c0_i32_0 = arith.constant 0 : i32
    %c0_i32_1 = arith.constant 0 : i32
    return %2, %c0_i32_0 : i32, i32
  }
  func.func @transform_1(%arg0: i32, %arg1: i32) -> (i32, i32) {
    %c0_i32 = arith.constant 0 : i32
    %c0_i32_0 = arith.constant 0 : i32
    return %arg0, %c0_i32 : i32, i32
  }
}

</mosaic_0001>

<bundles_post_ra>
// kernel: loss_forward.1
= control target key start
LH: loop header
LB: loop body
LE: loop exit
PB: predicated region body
PF: predicated region fallthrough
CT: control target
= control target key end

     0   :  { %6 = vsyncpa [#allocation3], 0  ;;  %s501_s0 = inlined_call_operand.hbm [shape: f32[16,128], index: 0, kind: input, shape index: {}]   ;;  %s502_s1 = inlined_call_operand.vmem [shape: f32[16,128], index: 1, kind: output, shape index: {}]  }
   0x1   :  { %8 = vsyncpa [#allocation3 + $0x1], 0  ;;  %s422_s6 = smov 0   ;;  %s424_s7 = smov 0  }
   0x2   :  { %s426_s8 = smov 0   ;;  %s428_s9 = smov 0  }
   0x3   :  { %s430_s10 = smov 0  }
   0x4 LB: > { %s260_s11 = sadd.s32 4294967295, %s407_s10   ;;  %s26_s12 = sadd.s32 1, %s403_s9  ;;  %s407_s10 = sphi %s430_s10, %s14_s10   ;;  %s403_s9 = sphi %s428_s9, %s509_s9   ;;  %s399_s8 = sphi %s426_s8, %s508_s8   ;;  %s395_s7 = sphi %s424_s7, %s491_s7   ;;  %s391_s6 = sphi %s422_s6, %s507_s6  }
   0x5   : > { %p28_p0 = scmp.ge.s32.totalorder %s26_s12, 2  ;;  %p388_p1 = scmp.ne.s32.totalorder %s395_s7, 0 }
   0x6   : > { %p47_p2 = scmp.eq.s32.totalorder %s407_s10, 0  ;;  %p52_p3 = scmp.ne.s32.totalorder %s395_s7, %s391_s6 }
   0x7   : > { %s511_s12 = smov (%p28_p0, %s26_s12), 0  ;;  %p53_p4 = scmp.eq.s32.totalorder %s260_s11, 0 }
   0x8   : > { %p48_p5 = por %p388_p1, %p47_p2  ;;  %p280_p7 = scmp.lt.s32.totalorder %s407_s10, 2 }
   0x9   : > { %p452_p6 = por %p53_p4, %p52_p3  ;;  %s409_s14 = smov [#allocation2]  }
   0xa   : > { %s116_s15 = sshll.u32 %s409_s14, 4  ;;  %p457_p8 = pnand %p280_p7, %p48_p5  ;;  %s117_s15 = int_to_ptr.vmem [resolvable:$true] %s116_s15 }
   0xb   : > { %s504_s13 = scalar_select %p452_p6, 1, 0 }
   0xc   : > { %s332_s19 = scalar_lea.hbm %s501_s0, 256  ;;  %p334_p10 = pneg %p457_p8 }
   0xd   : > { %p333_p9 = scmp.ne.s32.totalorder %s501_s0, %s332_s19  ;;  %p339_p13 = scmp.lt.s32.totalorder %s332_s19, %s332_s19 }
   0xf   : > { %p335_p11 = pnand %p334_p10, %p333_p9 }
  0x11   : > { %p336_p12 = pneg %p335_p11 }
  0x13   : > { %p341_p0 = pnand %p339_p13, %p336_p12 }
  0x15   : > { %344 = shalt.err (!%p341_p0)
}
  0x16   : > { %s345_s22 = scalar_lea.vmem %s117_s15, 256  ;;  %s352_s23 = scalar_lea.vmem %s117_s15, 512 }
  0x17   : > { %p346_p1 = scmp.ne.s32.totalorder %s117_s15, %s345_s22  ;;  %p353_p4 = scmp.lt.s32.totalorder %s117_s15, %s117_s15 }
  0x18   : > { %p354_p5 = scmp.lt.s32.totalorder %s352_s23, %s345_s22 }
  0x19   : > { %p348_p2 = pnand %p346_p1, %p334_p10 }
  0x1a   : > { %p355_p7 = por %p354_p5, %p353_p4 }
  0x1b   : > { %p349_p3 = pneg %p348_p2 }
  0x1d   : > { %p356_p6 = pnand %p355_p7, %p349_p3 }
  0x1f   : > { %359 = shalt.err (!%p356_p6)
}
  0x20   : > { %s410_s24 = smov 128   ;;  %s411_s25 = smov 8  }
  0x21   : > { %279 = dma.hbm_to_vmem [thread:$0]  (!%p457_p8), %s501_s0, 256, %s117_s15, [#allocation3], %s410_s24, %s410_s24, %s411_s25  }
  0x22   : > { %p267_p9 = scmp.ge.s32.totalorder %s407_s10, 1  ;;  %p124_p11 = scmp.lt.s32.totalorder %s407_s10, 3 }
  0x24   : > { %p125_p10 = pnand %p267_p9, %p124_p11 }
  0x25   : > { %s130_s28 = sand.u32 (!%p125_p10), 1, %s395_s7   ;;  %p506_p6 = scmp.ne.s32.totalorder (!%p125_p10), %s504_s13, 0 }
  0x26   : > { %128 = sbr.rel (%p125_p10) target bundleno = 57 (0x39), region = 24  ;;  %s268_s29 = sshll.u32 (!%p125_p10), %s130_s28, 4 }
  0x27   : > { %s131_s30 = scalar_lea.sflag (!%p125_p10), [#allocation3], %s130_s28  ;;  %s134_s2 = scalar_lea.vmem (!%p125_p10), [#allocation2], %s268_s29 }
  0x2b   : > { %385 = dma.done.wait (%p506_p6), %s131_s30, 256  }
  0x2c   : > { %387 = vsyncadd (%p506_p6), %s131_s30, 4294967040  ;;  %s270_s3 = sshll.u32 %s399_s8, 4  ;;  %v173_v0 = vlaneseq  ;;  %p156_p8 = scmp.lt.s32.totalorder %s399_s8, 1  ;;  %v165_v6 = vld [vmem:[%s134_s2] sm:$0xff]  ;;  %v166_v7 = vld [vmem:[%s134_s2 + $0x8] sm:$0xff] }
  0x2d   : > { %v176_v2 = vstv %s270_s3  ;;  %v167_v8 = vand.u32 2147483647, %v165_v6  ;;  %v168_v9 = vand.u32 2147483647, %v166_v7 }
  0x2e   : > { %v174_v1 = vshrl.u32 %v173_v0, 7  ;;  %s513_s8 = smov (!%p156_p8, %s399_s8), 1 }
  0x2f   : > { %v169_v10 = vsub.f32 1.0, %v167_v8  ;;  %v170_v11 = vsub.f32 1.0, %v168_v9  ;;  %s269_s4 = sshll.u32 %s513_s8, 3 }
  0x30   : > { %v175_v3 = vadd.s32 8, %v174_v1  ;;  %v177_v4 = vadd.s32 %v176_v2, %v174_v1  ;;  %s159_s11 = scalar_lea.vmem %s502_s1, %s269_s4 }
  0x32   : > { %v178_v5 = vadd.s32 %v176_v2, %v175_v3  ;;  %vm179_vm0 = vcmp.lt.s32.totalorder %v177_v4, 16 }
  0x33   : > { %v181_v12 = vsel %vm179_vm0, %v169_v10, 0.0 }
  0x34   : > { %vm180_vm1 = vcmp.lt.s32.totalorder %v178_v5, 16 }
  0x35   : > { %v182_v13 = vsel %vm180_vm1, %v170_v11, 0.0 }
  0x36   : > { %v184_v14 = vadd.f32 %v182_v13, %v181_v12 }
  0x38   : > { %186 = vst [vmem:[%s159_s11] sm:$0xff] %v184_v14 }
  0x39 PF: > { %s14_s10 = sadd.s32 1, %s407_s10   ;;  %s507_s6 = smov %s395_s7 }
  0x3a   : > { %p11_p12 = scmp.ge.s32.totalorder %s14_s10, 4   ;;  %s491_s7 = smov 0  }
  0x3b   : > { %s508_s8 = smov %s403_s9  ;;  %s509_s9 = smov %s511_s12 }
  0x3c   :  { %13 = sbr.rel (!%p11_p12) target bundleno = 4 (0x4), region = 68 }
  0x41   :  { %206 = vsyncpa [#allocation3], 1 }
  0x42   :  { %208 = vsyncpa [#allocation3 + $0x1], 1 }

</bundles_post_ra>
